<compile_context>
chip_gen: v7x
topology: tpu7x:2x2x1
jax: 0.10.0
libtpu: 0.0.40
codegen_flags: <defaults>
</compile_context>

<pallas_src>
import jax
import jax.numpy as jnp
from jax.experimental import pallas as pl
from jax.experimental.pallas import tpu as pltpu


def _round_up(x, m):
    return ((x + m - 1) // m) * m


def _critic_kernel_out1(x_ref, w1_ref, b1_ref, w2_ref, b2_ref, o_ref):
    """output_dim == 1 fast path.
    Blocks: x (TB, IMG), w1 (IMG, H), b1 (1, H), w2 (1, H), b2 (1, 1), o (1, TB)."""
    # First linear on the MXU, f32 accumulation; epilogue stays f32.
    h = jnp.dot(x_ref[...], w1_ref[...], preferred_element_type=jnp.float32)
    h = jnp.maximum(h + b1_ref[...], 0.0)                      # (TB, H) f32, VPU
    # Second layer (out_dim == 1): VPU multiply + lane (XLU) reduction instead
    # of a 1-wide MXU matmul; frees the MXU/vex slot entirely.
    logits = jnp.sum(h * w2_ref[...], axis=1)                  # (TB,)
    row = logits[None, :] + b2_ref[...]                        # (1, TB)
    o_ref[...] = jax.nn.sigmoid(row).astype(o_ref.dtype)       # lane-dense store


def _critic_kernel_general(x_ref, w1_ref, b1_ref, w2_ref, b2_ref, o_ref):
    """General output_dim path.
    Blocks: x (TB, IMG), w1 (IMG, H), b1 (1, H), w2 (H, OUT), b2 (1, OUT), o (TB, OUT)."""
    h = jnp.dot(x_ref[...], w1_ref[...], preferred_element_type=jnp.float32)
    h = jnp.maximum(h + b1_ref[...], 0.0)
    logits = jnp.dot(h, w2_ref[...], preferred_element_type=jnp.float32)
    o_ref[...] = jax.nn.sigmoid(logits + b2_ref[...]).astype(o_ref.dtype)


def discriminator_forward(x, w1_t, b1, w2_t, b2, *, use_bf16=True, tb=None):
    """x: [B, image_size]; w1_t: [image_size, hidden]; b1: [1, hidden];
    w2_t: [hidden, output]; b2: [1, output]  ->  [B, output]."""
    out_dtype = x.dtype
    B, img = x.shape
    hidden = w1_t.shape[1]
    out_dim = w2_t.shape[1]

    # Batch tile: single 8-aligned tile for small batches, otherwise 256
    # (multiple of 8 and 128; double-buffers inside v7x's 64 MiB VMEM even for
    # large flattened images).
    if tb is None:
        tb = _round_up(B, 8) if B <= 256 else 256
    b_pad = _round_up(B, tb)
    if b_pad != B:
        x = jnp.pad(x, ((0, b_pad - B), (0, 0)))
    n_tiles = b_pad // tb

    # bf16 only for the MXU-feeding operands; biases / epilogue remain f32.
    if use_bf16:
        x_in = x.astype(jnp.bfloat16)
        w1_in = w1_t.astype(jnp.bfloat16)
    else:
        x_in, w1_in = x, w1_t

    # Advisory cost estimate so XLA can overlap this small call with neighbours.
    flops = 2 * b_pad * img * hidden + 2 * b_pad * hidden * out_dim
    bytes_accessed = (x_in.size * x_in.dtype.itemsize
                      + w1_in.size * w1_in.dtype.itemsize
                      + (b1.size + w2_t.size + b2.size) * 4
                      + b_pad * out_dim * 4)
    cost = pl.CostEstimate(flops=int(flops),
                           transcendentals=int(b_pad * out_dim),
                           bytes_accessed=int(bytes_accessed))

    resident = lambda shape: pl.BlockSpec(shape, lambda i: tuple(0 for _ in shape))
    compiler_params = pltpu.CompilerParams(
        dimension_semantics=("parallel",),   # v7x: shard batch tiles across both TCs
        vmem_limit_bytes=32 * 1024 * 1024,   # fits v7x physical VMEM, headroom on v5e/v6e
    )

    if out_dim == 1:
        out_row = pl.pallas_call(
            _critic_kernel_out1,
            out_shape=jax.ShapeDtypeStruct((1, b_pad), jnp.float32),
            grid_spec=pl.GridSpec(
                grid=(n_tiles,),
                in_specs=[
                    pl.BlockSpec((tb, img), lambda i: (i, 0)),   # pipelined x tile
                    resident((img, hidden)),                     # W1 resident in VMEM
                    resident((1, hidden)),                       # b1 resident
                    resident((1, hidden)),                       # W2 as a lane-dense row
                    resident((1, 1)),                            # b2 resident
                ],
                out_specs=pl.BlockSpec((1, tb), lambda i: (0, i)),  # lane-dense output
            ),
            compiler_params=compiler_params,
            cost_estimate=cost,
        )(x_in, w1_in, b1, w2_t.reshape(1, hidden), b2.reshape(1, 1))
        out = out_row.reshape(b_pad, 1)
    else:
        out = pl.pallas_call(
            _critic_kernel_general,
            out_shape=jax.ShapeDtypeStruct((b_pad, out_dim), jnp.float32),
            grid_spec=pl.GridSpec(
                grid=(n_tiles,),
                in_specs=[
                    pl.BlockSpec((tb, img), lambda i: (i, 0)),
                    resident((img, hidden)),
                    resident((1, hidden)),
                    resident((hidden, out_dim)),
                    resident((1, out_dim)),
                ],
                out_specs=pl.BlockSpec((tb, out_dim), lambda i: (i, 0)),
            ),
            compiler_params=compiler_params,
            cost_estimate=cost,
        )(x_in, w1_in, b1, w2_t, b2)

    return out[:B].astype(out_dtype)


def init_linear_params(key, in_features, out_features):
    """Deterministic init matching nn.Linear's default U(-1/sqrt(in), 1/sqrt(in))."""
    kw, kb = jax.random.split(key)
    bound = 1.0 / jnp.sqrt(float(in_features))
    # Stored already transposed: [in_features, out_features]
    w_t = jax.random.uniform(kw, (in_features, out_features),
                             minval=-bound, maxval=bound, dtype=jnp.float32)
    b = jax.random.uniform(kb, (1, out_features),
                           minval=-bound, maxval=bound, dtype=jnp.float32)
    return w_t, b


if __name__ == "__main__":
    # Small shapes consistent with Discriminator(image_size, hidden_dim, output_dim)
    batch = 8
    image_size = 64   # e.g. a flattened 8x8 single-channel image
    hidden_dim = 32
    output_dim = 1

    key = jax.random.PRNGKey(0)
    kx, k1, k2 = jax.random.split(key, 3)

    x = jax.random.normal(kx, (batch, image_size), dtype=jnp.float32)
    w1_t, b1 = init_linear_params(k1, image_size, hidden_dim)
    w2_t, b2 = init_linear_params(k2, hidden_dim, output_dim)

    ref = jax.nn.sigmoid(jnp.maximum(x @ w1_t + b1, 0.0) @ w2_t + b2)

    # f32 path: exact module semantics.
    out_f32 = jax.block_until_ready(
        discriminator_forward(x, w1_t, b1, w2_t, b2, use_bf16=False))
    assert out_f32.shape == (batch, output_dim)
    assert jnp.allclose(out_f32, ref, atol=1e-5, rtol=1e-5)

    # bf16 MXU-feed path (preferred on v6e/v7x): looser tolerance vs f32 ref.
    out_bf16 = jax.block_until_ready(
        discriminator_forward(x, w1_t, b1, w2_t, b2, use_bf16=True))
    assert jnp.allclose(out_bf16, ref, atol=2e-2, rtol=2e-2)

    # Exercise the generic output_dim > 1 path as well.
    w3_t, b3 = init_linear_params(k2, hidden_dim, 8)
    ref2 = jax.nn.sigmoid(jnp.maximum(x @ w1_t + b1, 0.0) @ w3_t + b3)
    out2 = jax.block_until_ready(
        discriminator_forward(x, w1_t, b1, w3_t, b3, use_bf16=False))
    assert jnp.allclose(out2, ref2, atol=1e-5, rtol=1e-5)

    print("KERNEL_OK")
</pallas_src>

<mosaic_0001>
module attributes {stable_mosaic.version = 11 : i64} {
  func.func @_critic_kernel_out1(%arg0: i32, %arg1: memref<8x64xf32, #tpu.memory_space<vmem>>, %arg2: memref<64x32xf32, #tpu.memory_space<vmem>>, %arg3: memref<1x32xf32, #tpu.memory_space<vmem>>, %arg4: memref<1x32xf32, #tpu.memory_space<vmem>>, %arg5: memref<1x1xf32, #tpu.memory_space<vmem>>, %arg6: memref<1x8xf32, #tpu.memory_space<vmem>>) attributes {dimension_semantics = [#tpu.dimension_semantics<parallel>], iteration_bounds = array<i64: 1>, scalar_prefetch = 0 : i64, scratch_operands = 0 : i64, tpu.core_type = #tpu.core_type<tc>, window_params = [{transform_indices = @transform_0, window_bounds = array<i64: 8, 64>}, {pipeline_mode = #tpu.pipeline_mode<synchronous>, transform_indices = @transform_1, window_bounds = array<i64: 64, 32>}, {pipeline_mode = #tpu.pipeline_mode<synchronous>, transform_indices = @transform_2, window_bounds = array<i64: 1, 32>}, {pipeline_mode = #tpu.pipeline_mode<synchronous>, transform_indices = @transform_3, window_bounds = array<i64: 1, 32>}, {pipeline_mode = #tpu.pipeline_mode<synchronous>, transform_indices = @transform_4, window_bounds = array<i64: 1, 1>}, {transform_indices = @transform_5, window_bounds = array<i64: 1, 8>}]} {
    %c0 = arith.constant 0 : index
    %c0_0 = arith.constant 0 : index
    %0 = vector.load %arg1[%c0, %c0_0] : memref<8x64xf32, #tpu.memory_space<vmem>>, vector<8x64xf32>
    %c0_1 = arith.constant 0 : index
    %c0_2 = arith.constant 0 : index
    %1 = vector.load %arg2[%c0_1, %c0_2] : memref<64x32xf32, #tpu.memory_space<vmem>>, vector<64x32xf32>
    %cst = arith.constant dense<0.000000e+00> : vector<8x32xf32>
    %2 = tpu.matmul %0, %1, %cst {dimension_numbers = #tpu.dot_dimension_numbers<[1], [0], [0], [1], [0, 0, 1, 1], [], []>} : vector<8x64xf32>, vector<64x32xf32>, vector<8x32xf32> -> vector<8x32xf32>
    %c0_3 = arith.constant 0 : index
    %c0_4 = arith.constant 0 : index
    %3 = vector.load %arg3[%c0_3, %c0_4] : memref<1x32xf32, #tpu.memory_space<vmem>>, vector<1x32xf32>
    %4 = vector.broadcast %3 : vector<1x32xf32> to vector<8x32xf32>
    %5 = arith.addf %2, %4 : vector<8x32xf32>
    %cst_5 = arith.constant 0.000000e+00 : f32
    %6 = vector.broadcast %cst_5 : f32 to vector<8x32xf32>
    %7 = arith.maximumf %5, %6 : vector<8x32xf32>
    %c0_6 = arith.constant 0 : index
    %c0_7 = arith.constant 0 : index
    %8 = vector.load %arg4[%c0_6, %c0_7] : memref<1x32xf32, #tpu.memory_space<vmem>>, vector<1x32xf32>
    %9 = vector.broadcast %8 : vector<1x32xf32> to vector<8x32xf32>
    %10 = arith.mulf %7, %9 : vector<8x32xf32>
    %cst_8 = arith.constant dense<0.000000e+00> : vector<8xf32>
    %11 = vector.multi_reduction <add>, %10, %cst_8 [1] : vector<8x32xf32> to vector<8xf32>
    %12 = vector.shape_cast %11 : vector<8xf32> to vector<1x8xf32>
    %c0_9 = arith.constant 0 : index
    %c0_10 = arith.constant 0 : index
    %13 = vector.load %arg5[%c0_9, %c0_10] : memref<1x1xf32, #tpu.memory_space<vmem>>, vector<1x1xf32>
    %14 = vector.broadcast %13 : vector<1x1xf32> to vector<1x8xf32>
    %15 = arith.addf %12, %14 : vector<1x8xf32>
    %16 = arith.negf %15 : vector<1x8xf32>
    %17 = math.exp %16 : vector<1x8xf32>
    %cst_11 = arith.constant 1.000000e+00 : f32
    %18 = vector.broadcast %cst_11 : f32 to vector<1x8xf32>
    %19 = arith.addf %18, %17 : vector<1x8xf32>
    %20 = arith.divf %18, %19 : vector<1x8xf32>
    %c0_12 = arith.constant 0 : index
    %c0_13 = arith.constant 0 : index
    %21 = vector.load %arg6[%c0_12, %c0_13] : memref<1x8xf32, #tpu.memory_space<vmem>>, vector<1x8xf32>
    tpu.vector_store %arg6[%c0_12, %c0_13], %20 {strides = array<i32>} : memref<1x8xf32, #tpu.memory_space<vmem>>, vector<1x8xf32>,
    return
  }
  func.func @transform_0(%arg0: i32) -> (i32, i32) {
    %c0_i32 = arith.constant 0 : i32
    %c0_i32_0 = arith.constant 0 : i32
    return %arg0, %c0_i32 : i32, i32
  }
  func.func @transform_1(%arg0: i32) -> (i32, i32) {
    %c0_i32 = arith.constant 0 : i32
    %c0_i32_0 = arith.constant 0 : i32
    %c0_i32_1 = arith.constant 0 : i32
    return %c0_i32, %c0_i32_0 : i32, i32
  }
  func.func @transform_2(%arg0: i32) -> (i32, i32) {
    %c0_i32 = arith.constant 0 : i32
    %c0_i32_0 = arith.constant 0 : i32
    %c0_i32_1 = arith.constant 0 : i32
    return %c0_i32, %c0_i32_0 : i32, i32
  }
  func.func @transform_3(%arg0: i32) -> (i32, i32) {
    %c0_i32 = arith.constant 0 : i32
    %c0_i32_0 = arith.constant 0 : i32
    %c0_i32_1 = arith.constant 0 : i32
    return %c0_i32, %c0_i32_0 : i32, i32
  }
  func.func @transform_4(%arg0: i32) -> (i32, i32) {
    %c0_i32 = arith.constant 0 : i32
    %c0_i32_0 = arith.constant 0 : i32
    %c0_i32_1 = arith.constant 0 : i32
    return %c0_i32, %c0_i32_0 : i32, i32
  }
  func.func @transform_5(%arg0: i32) -> (i32, i32) {
    %c0_i32 = arith.constant 0 : i32
    %c0_i32_0 = arith.constant 0 : i32
    return %c0_i32, %arg0 : i32, i32
  }
}

</mosaic_0001>

<bundles_post_ra>
// kernel: tpu_custom_call.1
= control target key start
LH: loop header
LB: loop body
LE: loop exit
PB: predicated region body
PF: predicated region fallthrough
CT: control target
= control target key end

     0   :  { %s328_s0 = inlined_call_operand.vmem [shape: f32[8,64], index: 0, kind: input, shape index: {}]   ;;  %s329_s1 = inlined_call_operand.vmem [shape: f32[64,32], index: 1, kind: input, shape index: {}]   ;;  %s330_s2 = inlined_call_operand.vmem [shape: f32[1,32], index: 2, kind: input, shape index: {}]   ;;  %s331_s3 = inlined_call_operand.vmem [shape: f32[1,32], index: 3, kind: input, shape index: {}]   ;;  %s332_s4 = inlined_call_operand.<no memory space> [shape: f32[1,1], index: 4, kind: input, shape index: {}]   ;;  %s333_s5 = inlined_call_operand.hbm [shape: f32[1,8], index: 5, kind: output, shape index: {}]  }
   0x1   :  { %v10_v0 = vstv %s332_s4 }
   0x2   :  { %11 = vst [vmem:[#allocation2] sm:$0x1] %v10_v0 }
   0x3   :  { %v24_v1 = vld [vmem:[%s329_s1] sm:$0xff]  ;;  %v25_v2 = vld [vmem:[%s329_s1 + $0x8] sm:$0xff]  ;;  %v26_v3 = vld [vmem:[%s329_s1 + $0x10] sm:$0xff]  ;;  %v245_v4 = vmov 0.0|0.0   ;;  %vm246_vm0 = vmmov 0   ;;  %v247_v7 = vmov 0.0  }
   0x4   :  { %199 = vmatprep.subr.bf16.mxu0 %v245_v4  ;;  %v200_v5 = vpack.c.bf16 %v25_v2, %v24_v1  ;;  %v27_v6 = vld [vmem:[%s329_s1 + $0x18] sm:$0xff]  ;;  %196 = vmatprep.mubr.msk.f32.mxu0 %vm246_vm0, %v247_v7 }
   0x5   :  { %v203_v8 = vpack.c.bf16 %v27_v6, %v26_v3 }
   0x6   :  { %201 = vmatpush3.bf16.msra.mxu0 %v200_v5 }
   0x7   :  { %12 = vsyncpa [#allocation4], 0  ;;  %202 = vmatprep.subr.bf16.mxu0 %v245_v4  ;;  %v28_v9 = vld [vmem:[%s329_s1 + $0x20] sm:$0xff]  ;;  %v29_v10 = vld [vmem:[%s329_s1 + $0x28] sm:$0xff]  ;;  %vm39_vm1 = vcmask 523264   ;;  %v248_v16 = vmov 0   ;;  %v132_v26 = vlaneseq }
   0x8   :  { %v206_v11 = vpack.c.bf16 %v29_v10, %v28_v9  ;;  %v30_v12 = vld [vmem:[%s329_s1 + $0x30] sm:$0xff]  ;;  %v31_v13 = vld [vmem:[%s329_s1 + $0x38] sm:$0xff]  ;;  %v23_v15 = vld [vmem:[%s328_s0] sm:$0xff]  ;;  %216 = vset.pattern.permute.xlu0 %v248_v16  ;;  %vm122_vm2 = vcmask 261120   ;;  %s249_s0 = smov [#allocation3]   ;;  %vm151_vm3 = vcmask 57344  }
   0x9   :  { %v209_v14 = vpack.c.bf16 %v31_v13, %v30_v12  ;;  %v167_v17 = vld [vmem:[%s330_s2] ss:$0 sm:$0xff]  ;;  %v133_v27 = vshrl.u32 %v132_v26, 7  ;;  %v145_v36 = vand.u32 127, %v132_v26  ;;  %s159_s2 = sshll.u32 %s249_s0, 4  ;;  %s160_s2 = int_to_ptr.vmem [resolvable:$true] %s159_s2 }
   0xa   :  { %204 = vmatpush3.bf16.msra.mxu0 %v203_v8  ;;  %v169_v21 = vld [vmem:[%s331_s3] ss:$0 sm:$0xff]  ;;  %s221_s3 = scalar_lea.vmem %s160_s2, 16  ;;  %s225_s15 = scalar_lea.vmem %s160_s2, 32 }
   0xb   :  { %205 = vmatprep.subr.bf16.mxu0 %v245_v4  ;;  %v126_v25 = vld [vmem:[#allocation2] sm:$0x1]  ;;  %v134_v29 = vsub.s32 0, %v133_v27  ;;  %v148_v37 = vsub.s32 %v145_v36, %v133_v27  ;;  %p222_p0 = scmp.ne.s32.totalorder %s160_s2, %s221_s3  ;;  %p226_p1 = scmp.lt.s32.totalorder %s160_s2, %s160_s2 }
   0xc   :  { %p227_p2 = scmp.lt.s32.totalorder %s225_s15, %s221_s3 }
   0xe   :  { %207 = vmatpush3.bf16.msra.mxu0 %v206_v11  ;;  %p228_p3 = por %p227_p2, %p226_p1 }
   0xf   :  { %208 = vmatprep.subr.bf16.mxu0 %v245_v4 }
  0x10   :  { %p229_p4 = pnand %p228_p3, %p222_p0 }
  0x12   :  { %210 = vmatpush3.bf16.msra.mxu0 %v209_v14 }
  0x15   :  { %197 = vmatmul.mubr.msk.f32.vlgmr.msra.gmra.mrb[0].mxu0 %vm39_vm1, %v23_v15 }
  0xe8   :  { %v109_v18 = vpop.f32.mrb[0].mxu0 }
  0xe9   :  { %v110_v19 = vadd.f32 %v167_v17, %v109_v18  ;;  %v198_v20 = vpop.f32.mrb[1].mxu0 }
  0xeb   :  { %v113_v22 = vmax.f32 %v110_v19, 0.0 }
  0xed   :  { %v121_v23 = vmul.f32 %v169_v21, %v113_v22 }
  0xef   :  { %v123_v24 = vsel %vm122_vm2, %v121_v23, 0.0 }
  0xf0   :  { %124 = vadd.xlane.f32.xlu0 %v123_v24 }
 0x106   :  { %129 = vperm.xlu0 %216, %v126_v25  }
 0x17d   :  { %v125_v28 = vpop.xlane.xlu0 %124 }
 0x185   :  { %v130_v30 = vpop.permute.xlu0 %129 }
 0x186   :  { %v135_v31 = vrot.slane %v130_v30, %v134_v29 }
 0x188   :  { %v136_v32 = vadd.f32 %v135_v31, %v125_v28 }
 0x18a   :  { %v170_v33 = vmul.f32 -1.442695, %v136_v32 }
 0x18c   :  { %217 = vpow2.f32 %v170_v33 }
 0x196   :  { %v218_v34 = vpop.eup %217 }
 0x197   :  { %v140_v35 = vadd.f32 1.0, %v218_v34 }
 0x199   :  { %219 = vrcp.f32 %v140_v35 }
 0x1a3   :  { %v220_v38 = vpop.eup %219 }
 0x1a4   :  { %v149_v39 = vrot.slane %v220_v38, %v148_v37 }
 0x1a6   :  { %152 = vst.msk [vmem:[#allocation3] sm:$0x1] %vm151_vm3, %v149_v39 }
 0x1a7   :  { %232 = shalt.err (!%p229_p4)
}
 0x1a8   :  { %s233_s18 = scalar_lea.hbm %s333_s5, 16 }
 0x1a9   :  { %p234_p5 = scmp.ne.s32.totalorder %s333_s5, %s233_s18  ;;  %p237_p6 = scmp.lt.u32.totalorder %s233_s18, %s333_s5 }
 0x1ab   :  { %p239_p7 = pnand %p237_p6, %p234_p5 }
 0x1ad   :  { %242 = shalt.err (!%p239_p7)
}
 0x1ae   :  { %162 = dma.vmem_to_hbm [thread:$0]  %s160_s2, 16, %s333_s5, [#allocation4]  }
 0x1af   :  { %243 = dma.done.wait [#allocation4], 16  }
 0x1b0   :  { %244 = vsyncadd [#allocation4], 4294967280 }
 0x1b1   :  { %166 = vsyncpa [#allocation4], 1 }

</bundles_post_ra>
